<compile_context>
chip_gen: v6e
topology: v6e:2x2x1
jax: 0.10.0
libtpu: 0.0.40
codegen_flags: <defaults>
</compile_context>

<pallas_src>
import functools
import math

import jax
import jax.numpy as jnp
from jax.experimental import pallas as pl
from jax.experimental.pallas import tpu as pltpu


# ---------------------------------------------------------------------------
# Parameter initialization (deterministic, mirrors the PyTorch __init__ shapes)
# ---------------------------------------------------------------------------
def make_a():
    """The fixed 4 quaternion 'rule' matrices, shape (4, 4, 4)."""
    mat1 = jnp.eye(4, dtype=jnp.float32)
    mat2 = jnp.array([[0, -1, 0, 0], [1, 0, 0, 0], [0, 0, 0, -1], [0, 0, 1, 0]],
                     dtype=jnp.float32)
    mat3 = jnp.array([[0, 0, -1, 0], [0, 0, 0, 1], [1, 0, 0, 0], [0, -1, 0, 0]],
                     dtype=jnp.float32)
    mat4 = jnp.array([[0, 0, 0, -1], [0, 0, -1, 0], [0, 1, 0, 0], [1, 0, 0, 0]],
                     dtype=jnp.float32)
    return jnp.stack([mat1, mat2, mat3, mat4], axis=0)


def quaternion_s_init(key, n, in_features, out_features, kernel_size):
    """Deterministic quaternion-glorot init of `s`, shape (4, Cin//n, Cout//n, K, K)."""
    I, O = in_features // n, out_features // n
    K = kernel_size
    fan_in = (out_features // n) * K * K
    fan_out = (in_features // n) * K * K
    scale = 1.0 / math.sqrt(2.0 * (fan_in + fan_out))
    shape = (I, O, K, K)
    k_mod, k_vec, k_phase = jax.random.split(key, 3)
    g = jax.random.normal(k_mod, (4,) + shape, dtype=jnp.float32)
    modulus = scale * jnp.sqrt(jnp.sum(g * g, axis=0))          # chi(4, scale)
    v = jax.random.uniform(k_vec, (3,) + shape, minval=-1.0, maxval=1.0,
                           dtype=jnp.float32)
    v = v / jnp.sqrt(jnp.sum(v * v, axis=0, keepdims=True) + 1e-4)
    phase = jax.random.uniform(k_phase, shape, minval=-jnp.pi, maxval=jnp.pi,
                               dtype=jnp.float32)
    s_r = modulus * jnp.cos(phase)
    s_i = modulus * v[0] * jnp.sin(phase)
    s_j = modulus * v[1] * jnp.sin(phase)
    s_k = modulus * v[2] * jnp.sin(phase)
    return jnp.stack([s_r, s_i, s_j, s_k], axis=0)


# ---------------------------------------------------------------------------
# Pallas kernels: tiled GEMM (+bias).  Operands bf16 (or mxu_dtype), f32 acc.
# ---------------------------------------------------------------------------
def _gemm_bias_kernel(a_ref, w_ref, b_ref, o_ref):
    """Single-K-tile GEMM: one MXU pass + bias, cast to o_ref.dtype on store."""
    acc = jnp.dot(a_ref[...], w_ref[...], preferred_element_type=jnp.float32)
    o_ref[...] = (acc + b_ref[...]).astype(o_ref.dtype)


def _gemm_bias_acc_kernel(a_ref, w_ref, b_ref, o_ref, acc_ref):
    """K-tiled GEMM with f32 VMEM accumulator (P3: init at k==0, store at k==last)."""
    @pl.when(pl.program_id(2) == 0)
    def _init():
        acc_ref[...] = jnp.zeros_like(acc_ref)

    acc_ref[...] += jnp.dot(a_ref[...], w_ref[...],
                            preferred_element_type=jnp.float32)

    @pl.when(pl.program_id(2) == pl.num_programs(2) - 1)
    def _store():
        o_ref[...] = (acc_ref[...] + b_ref[...]).astype(o_ref.dtype)


# ---------------------------------------------------------------------------
# Small helpers
# ---------------------------------------------------------------------------
def _round_up(x, m):
    return ((x + m - 1) // m) * m


def _plan_tiles(total, target, align, prefer_256=False):
    """Split `total` into `grid` tiles of size `tile` (tile % align == 0)."""
    grid = max(1, -(-total // target))
    tile = _round_up(-(-total // grid), align)
    # Prefer 256-aligned tiles (v6e/v7x MXU is 2x256^2) when the extra zero
    # padding stays negligible.
    if prefer_256 and tile % 256 != 0:
        tile256 = _round_up(tile, 256)
        if grid * tile256 - total <= max(total // 16, 128):
            tile = tile256
    return grid, tile


def _vmem_limit_bytes():
    """Per-generation scoped-VMEM limit: ~3/4 of physical, capped at 96 MiB."""
    try:
        cap = int(pltpu.get_tpu_info().vmem_capacity_bytes)
    except Exception:                       # unknown part: assume smallest (v7x)
        cap = 64 * 1024 * 1024
    return int(min(cap * 3 // 4, 96 * 1024 * 1024))


def _phm_gemm(A_p, W_p, b_p, *, TM, TN, TK, grid, out_dtype, vmem_limit,
              single_buffer_consts):
    """Tiled (M, N, K) Pallas GEMM with bias, out in `out_dtype`."""
    grid_m, grid_n, grid_k = grid
    Mpad = A_p.shape[0]
    Npad = W_p.shape[1]

    const_kwargs = {}
    if single_buffer_consts:
        # Weight / bias index maps are grid-constant here: single-buffering
        # halves their resident VMEM at zero cost (review item 1).
        const_kwargs = dict(pipeline_mode=pl.Buffered(1))

    in_specs = [
        pl.BlockSpec((TM, TK), lambda i, j, k: (i, k)),
        pl.BlockSpec((TK, TN), lambda i, j, k: (k, j), **const_kwargs),
        pl.BlockSpec((1, TN), lambda i, j, k: (0, j), **const_kwargs),
    ]
    out_specs = pl.BlockSpec((TM, TN), lambda i, j, k: (i, j))

    if grid_k == 1:
        kernel, scratch = _gemm_bias_kernel, ()
    else:
        kernel = _gemm_bias_acc_kernel
        scratch = (pltpu.VMEM((TM, TN), jnp.float32),)

    return pl.pallas_call(
        kernel,
        out_shape=jax.ShapeDtypeStruct((Mpad, Npad), out_dtype),
        grid=grid,
        in_specs=in_specs,
        out_specs=out_specs,
        scratch_shapes=scratch,
        compiler_params=pltpu.CompilerParams(
            dimension_semantics=("parallel", "parallel", "arbitrary"),
            vmem_limit_bytes=vmem_limit),
    )(A_p, W_p, b_p)


# ---------------------------------------------------------------------------
# Wrapper: PHM weight build, phase decomposition, im2col, Pallas GEMM,
#          depth-to-space.  Accepts / returns NCHW like the PyTorch module.
# ---------------------------------------------------------------------------
def phm_transpose_conv(x_nchw, a, s, bias, *, stride, padding, output_padding,
                       mxu_dtype=jnp.bfloat16, out_dtype=None):
    if out_dtype is None:
        out_dtype = mxu_dtype
    n = a.shape[0]
    _, I, O, K, _ = s.shape
    Cin, Cout = n * I, n * O
    B, Cx, Hin, Win = x_nchw.shape
    assert Cx == Cin, (Cx, Cin)
    st = int(stride)

    lo = K - 1 - padding
    if lo < 0:
        # TODO(synk): fall back to an explicit input-dilated conv for padding > kernel_size - 1.
        raise ValueError(
            f"phm_transpose_conv requires padding <= kernel_size - 1 "
            f"(got padding={padding}, kernel_size={K})")
    OH = (Hin - 1) * st - 2 * padding + K + output_padding
    OW = (Win - 1) * st - 2 * padding + K + output_padding

    if bias is None:
        bias = jnp.zeros((Cout,), jnp.float32)

    # --- PHM weight:  W = sum_q kron(a[q], s[q])  -> (Cin, Cout, K, K) -------
    Wfull = jnp.einsum('qab,qiokl->aibokl', a, s).reshape(Cin, Cout, K, K)
    # Spatially flipped, (kh, kw, Cin, Cout): conv_transpose2d is a correlation
    # of the (virtually) dilated input with this flipped kernel.
    Wf = jnp.transpose(Wfull[:, :, ::-1, ::-1], (2, 3, 0, 1)).astype(jnp.float32)

    # --- Sub-pixel (phase) decomposition --------------------------------------
    # Output row oh = st*m + ph only receives taps kh with (ph + kh - lo) % st == 0,
    # reading input row m + d, d = (ph + kh - lo) // st.  All phases share one
    # Ku x Ku window on a lightly zero-padded *undilated* input.
    taps = []
    max_d = 0
    for ph in range(st):
        lst = [(k, (ph + k - lo) // st) for k in range(K)
               if (ph + k - lo) % st == 0]
        taps.append(lst)
        if lst:
            max_d = max(max_d, max(d for _, d in lst))
    P_lo = lo // st                    # zero-pad rows/cols on top/left
    Ku = P_lo + max_d + 1              # shared window extent (H and W)
    Mh, Mw = -(-OH // st), -(-OW // st)
    P_hi_h = max(0, (Mh - 1) + max_d - (Hin - 1))
    P_hi_w = max(0, (Mw - 1) + max_d - (Win - 1))

    # Scatter the flipped kernel into the phase-decomposed GEMM weight:
    #   Wp[uh, uw, ci, ph, pw, co]
    Wp = jnp.zeros((Ku, Ku, Cin, st, st, Cout), jnp.float32)
    for ph in range(st):
        for kh, dh in taps[ph]:
            assert 0 <= dh + P_lo < Ku, (dh, P_lo, Ku)
            for pw in range(st):
                for kw, dw in taps[pw]:
                    assert 0 <= dw + P_lo < Ku, (dw, P_lo, Ku)
                    Wp = Wp.at[dh + P_lo, dw + P_lo, :, ph, pw, :].set(Wf[kh, kw])

    Kc = Ku * Ku * Cin                 # GEMM contraction depth
    Nc = st * st * Cout                # GEMM output channels (phases folded in)
    Mtot = B * Mh * Mw

    # --- tile plan -------------------------------------------------------------
    grid_m, TM = _plan_tiles(Mtot, 512, 128 if Mtot >= 128 else 8)
    grid_n, TN = _plan_tiles(Nc, 512, 128, prefer_256=True)
    grid_k, TK = _plan_tiles(Kc, 2048, 128, prefer_256=True)
    Mpad, Npad, Kpad = grid_m * TM, grid_n * TN, grid_k * TK

    # --- im2col on the *undilated* input (trace-time layout plumbing) ---------
    # TODO(synk): pull this Ku^2 tap gather into the kernel (halo DMAs / an
    # Element-indexed K grid axis) to avoid the ~Ku^2 x input replication in HBM
    # for large spatial shapes.
    x = jnp.transpose(x_nchw, (0, 2, 3, 1)).astype(mxu_dtype)   # NHWC, cast early
    x_pad = jnp.pad(x, ((0, 0), (P_lo, P_hi_h), (P_lo, P_hi_w), (0, 0)))
    cols = [x_pad[:, uh:uh + Mh, uw:uw + Mw, :]
            for uh in range(Ku) for uw in range(Ku)]
    patches = jnp.concatenate(cols, axis=-1)          # (B, Mh, Mw, Kc)
    A = patches.reshape(Mtot, Kc)
    if Mpad != Mtot or Kpad != Kc:
        A = jnp.pad(A, ((0, Mpad - Mtot), (0, Kpad - Kc)))

    W_p = jnp.pad(Wp.reshape(Kc, Nc),
                  ((0, Kpad - Kc), (0, Npad - Nc))).astype(mxu_dtype)
    b_p = jnp.pad(jnp.tile(bias.astype(jnp.float32), st * st).reshape(1, Nc),
                  ((0, 0), (0, Npad - Nc)))

    single_buf = (grid_n == 1 and grid_k == 1)   # weight/bias grid-constant
    gemm_kwargs = dict(TM=TM, TN=TN, TK=TK, grid=(grid_m, grid_n, grid_k),
                       out_dtype=out_dtype, vmem_limit=_vmem_limit_bytes())
    if single_buf:
        try:
            out2d = _phm_gemm(A, W_p, b_p, single_buffer_consts=True,
                              **gemm_kwargs)
        except Exception:
            # pipeline_mode=pl.Buffered(1) not supported by this JAX build;
            # fall back to default double buffering (correctness unaffected).
            out2d = _phm_gemm(A, W_p, b_p, single_buffer_consts=False,
                              **gemm_kwargs)
    else:
        out2d = _phm_gemm(A, W_p, b_p, single_buffer_consts=False,
                          **gemm_kwargs)

    # --- un-pad + depth-to-space (interleave the stride**2 phases) ------------
    if Mpad != Mtot or Npad != Nc:
        out2d = out2d[:Mtot, :Nc]
    y = out2d.reshape(B, Mh, Mw, st, st, Cout)
    y = jnp.transpose(y, (0, 1, 3, 2, 4, 5)).reshape(B, Mh * st, Mw * st, Cout)
    y = y[:, :OH, :OW, :]
    return jnp.transpose(y, (0, 3, 1, 2))             # back to NCHW


# ---------------------------------------------------------------------------
# Pure-XLA reference: exact conv_transpose2d via a dilated conv (f32, HIGHEST).
# ---------------------------------------------------------------------------
def phm_transpose_conv_reference(x_nchw, a, s, bias, *, stride, padding,
                                 output_padding):
    n = a.shape[0]
    _, I, O, K, _ = s.shape
    Cin, Cout = n * I, n * O
    W = jnp.einsum('qab,qiokl->aibokl', a, s).reshape(Cin, Cout, K, K)
    out = jax.lax.conv_general_dilated(
        x_nchw.astype(jnp.float32),
        jnp.transpose(W, (1, 0, 2, 3))[:, :, ::-1, ::-1].astype(jnp.float32),
        window_strides=(1, 1),
        padding=[(K - 1 - padding, K - 1 - padding + output_padding)] * 2,
        lhs_dilation=(stride, stride),
        dimension_numbers=('NCHW', 'OIHW', 'NCHW'),
        precision=jax.lax.Precision.HIGHEST)
    if bias is not None:
        out = out + bias.astype(jnp.float32)[None, :, None, None]
    return out


# ---------------------------------------------------------------------------
if __name__ == "__main__":
    root_key = jax.random.PRNGKey(0)

    def run_case(case_key, *, n, Cin, Cout, K, stride, padding, output_padding,
                 batch, hw, use_jit, tol):
        k_s, k_x, k_b = jax.random.split(case_key, 3)
        a = make_a()                                           # (4, 4, 4)
        s = quaternion_s_init(k_s, n, Cin, Cout, K)            # (4, Cin/n, Cout/n, K, K)
        bound = 1.0 / math.sqrt(Cin)
        bias = jax.random.uniform(k_b, (Cout,), jnp.float32, -bound, bound)
        x = jax.random.normal(k_x, (batch, Cin, hw, hw), dtype=jnp.float32)

        if use_jit:
            fn = jax.jit(functools.partial(
                phm_transpose_conv, stride=stride, padding=padding,
                output_padding=output_padding))
            out = fn(x, a, s, bias)
        else:
            out = phm_transpose_conv(x, a, s, bias, stride=stride,
                                     padding=padding,
                                     output_padding=output_padding)
        out = jax.block_until_ready(out)

        OH = (hw - 1) * stride - 2 * padding + K + output_padding
        assert out.shape == (batch, Cout, OH, OH), out.shape

        ref = phm_transpose_conv_reference(x, a, s, bias, stride=stride,
                                           padding=padding,
                                           output_padding=output_padding)
        out32 = out.astype(jnp.float32)
        err = float(jnp.max(jnp.abs(out32 - ref)))
        # bf16 MXU operands (f32 accumulation) + bf16 output vs an f32
        # HIGHEST-precision reference: abs error ~ sqrt(taps*Cin) * 2^-9 * |w||x|
        # plus |out| * 2^-9, comfortably below the tolerances used here.
        assert jnp.allclose(out32, ref, atol=tol, rtol=tol), (out.shape, err)
        return err

    # Case 1: small decoder block -- exercises the fused single-K-tile kernel
    # with grid-constant, single-buffered weight/bias.  Run eagerly so the
    # Buffered(1) capability probe (try/except) covers backend compilation too.
    run_case(jax.random.fold_in(root_key, 1), n=4, Cin=8, Cout=16, K=4,
             stride=2, padding=1, output_padding=0, batch=2, hw=8,
             use_jit=False, tol=3e-2)

    # Case 2: wider channels -- exercises M/N/K tiling with the f32 VMEM
    # accumulator kernel (grid = (2, 2, 2)); run under jax.jit so the wrapper
    # im2col / pad / cast plumbing fuses around the kernel.
    run_case(jax.random.fold_in(root_key, 2), n=4, Cin=256, Cout=256, K=4,
             stride=2, padding=1, output_padding=0, batch=3, hw=16,
             use_jit=True, tol=4e-2)

    print("KERNEL_OK")
</pallas_src>

<mosaic_0001>
module attributes {stable_mosaic.version = 11 : i64} {
  func.func @_gemm_bias_kernel(%arg0: i32, %arg1: i32, %arg2: i32, %arg3: memref<128x128xbf16, #tpu.memory_space<vmem>>, %arg4: memref<128x128xbf16, #tpu.memory_space<vmem>>, %arg5: memref<1x128xf32, #tpu.memory_space<vmem>>, %arg6: memref<128x128xbf16, #tpu.memory_space<vmem>>) attributes {dimension_semantics = [#tpu.dimension_semantics<parallel>, #tpu.dimension_semantics<parallel>, #tpu.dimension_semantics<arbitrary>], iteration_bounds = array<i64: 1, 1, 1>, scalar_prefetch = 0 : i64, scratch_operands = 0 : i64, tpu.core_type = #tpu.core_type<tc>, window_params = [{transform_indices = @transform_0, window_bounds = array<i64: 128, 128>}, {pipeline_mode = #tpu.pipeline_mode<synchronous>, transform_indices = @transform_1, window_bounds = array<i64: 128, 128>}, {pipeline_mode = #tpu.pipeline_mode<synchronous>, transform_indices = @transform_2, window_bounds = array<i64: 1, 128>}, {transform_indices = @transform_3, window_bounds = array<i64: 128, 128>}]} {
    %c0 = arith.constant 0 : index
    %c0_0 = arith.constant 0 : index
    %0 = vector.load %arg3[%c0, %c0_0] : memref<128x128xbf16, #tpu.memory_space<vmem>>, vector<128x128xbf16>
    %c0_1 = arith.constant 0 : index
    %c0_2 = arith.constant 0 : index
    %1 = vector.load %arg4[%c0_1, %c0_2] : memref<128x128xbf16, #tpu.memory_space<vmem>>, vector<128x128xbf16>
    %cst = arith.constant dense<0.000000e+00> : vector<128x128xf32>
    %2 = tpu.matmul %0, %1, %cst {dimension_numbers = #tpu.dot_dimension_numbers<[1], [0], [0], [1], [0, 0, 1, 1], [], []>} : vector<128x128xbf16>, vector<128x128xbf16>, vector<128x128xf32> -> vector<128x128xf32>
    %c0_3 = arith.constant 0 : index
    %c0_4 = arith.constant 0 : index
    %3 = vector.load %arg5[%c0_3, %c0_4] : memref<1x128xf32, #tpu.memory_space<vmem>>, vector<1x128xf32>
    %4 = vector.broadcast %3 : vector<1x128xf32> to vector<128x128xf32>
    %5 = arith.addf %2, %4 : vector<128x128xf32>
    %6 = arith.truncf %5 : vector<128x128xf32> to vector<128x128xbf16>
    %c0_5 = arith.constant 0 : index
    %c0_6 = arith.constant 0 : index
    %7 = vector.load %arg6[%c0_5, %c0_6] : memref<128x128xbf16, #tpu.memory_space<vmem>>, vector<128x128xbf16>
    tpu.vector_store %arg6[%c0_5, %c0_6], %6 {strides = array<i32>} : memref<128x128xbf16, #tpu.memory_space<vmem>>, vector<128x128xbf16>,
    return
  }
  func.func @transform_0(%arg0: i32, %arg1: i32, %arg2: i32) -> (i32, i32) {
    %c0_i32 = arith.constant 0 : i32
    return %arg0, %arg2 : i32, i32
  }
  func.func @transform_1(%arg0: i32, %arg1: i32, %arg2: i32) -> (i32, i32) {
    %c0_i32 = arith.constant 0 : i32
    return %arg2, %arg1 : i32, i32
  }
  func.func @transform_2(%arg0: i32, %arg1: i32, %arg2: i32) -> (i32, i32) {
    %c0_i32 = arith.constant 0 : i32
    %c0_i32_0 = arith.constant 0 : i32
    return %c0_i32, %arg1 : i32, i32
  }
  func.func @transform_3(%arg0: i32, %arg1: i32, %arg2: i32) -> (i32, i32) {
    %c0_i32 = arith.constant 0 : i32
    return %arg0, %arg1 : i32, i32
  }
}

module attributes {stable_mosaic.version = 11 : i64} {
  func.func @_gemm_bias_kernel(%arg0: i32, %arg1: i32, %arg2: i32, %arg3: memref<128x128xbf16, #tpu.memory_space<vmem>>, %arg4: memref<128x128xbf16, #tpu.memory_space<vmem>>, %arg5: memref<1x128xf32, #tpu.memory_space<vmem>>, %arg6: memref<128x128xbf16, #tpu.memory_space<vmem>>) attributes {dimension_semantics = [#tpu.dimension_semantics<parallel>, #tpu.dimension_semantics<parallel>, #tpu.dimension_semantics<arbitrary>], iteration_bounds = array<i64: 1, 1, 1>, scalar_prefetch = 0 : i64, scratch_operands = 0 : i64, tpu.core_type = #tpu.core_type<tc>, window_params = [{transform_indices = @transform_0, window_bounds = array<i64: 128, 128>}, {transform_indices = @transform_1, window_bounds = array<i64: 128, 128>}, {transform_indices = @transform_2, window_bounds = array<i64: 1, 128>}, {transform_indices = @transform_3, window_bounds = array<i64: 128, 128>}]} {
    %c0 = arith.constant 0 : index
    %c0_0 = arith.constant 0 : index
    %0 = vector.load %arg3[%c0, %c0_0] : memref<128x128xbf16, #tpu.memory_space<vmem>>, vector<128x128xbf16>
    %c0_1 = arith.constant 0 : index
    %c0_2 = arith.constant 0 : index
    %1 = vector.load %arg4[%c0_1, %c0_2] : memref<128x128xbf16, #tpu.memory_space<vmem>>, vector<128x128xbf16>
    %cst = arith.constant dense<0.000000e+00> : vector<128x128xf32>
    %2 = tpu.matmul %0, %1, %cst {dimension_numbers = #tpu.dot_dimension_numbers<[1], [0], [0], [1], [0, 0, 1, 1], [], []>} : vector<128x128xbf16>, vector<128x128xbf16>, vector<128x128xf32> -> vector<128x128xf32>
    %c0_3 = arith.constant 0 : index
    %c0_4 = arith.constant 0 : index
    %3 = vector.load %arg5[%c0_3, %c0_4] : memref<1x128xf32, #tpu.memory_space<vmem>>, vector<1x128xf32>
    %4 = vector.broadcast %3 : vector<1x128xf32> to vector<128x128xf32>
    %5 = arith.addf %2, %4 : vector<128x128xf32>
    %6 = arith.truncf %5 : vector<128x128xf32> to vector<128x128xbf16>
    %c0_5 = arith.constant 0 : index
    %c0_6 = arith.constant 0 : index
    %7 = vector.load %arg6[%c0_5, %c0_6] : memref<128x128xbf16, #tpu.memory_space<vmem>>, vector<128x128xbf16>
    tpu.vector_store %arg6[%c0_5, %c0_6], %6 {strides = array<i32>} : memref<128x128xbf16, #tpu.memory_space<vmem>>, vector<128x128xbf16>,
    return
  }
  func.func @transform_0(%arg0: i32, %arg1: i32, %arg2: i32) -> (i32, i32) {
    %c0_i32 = arith.constant 0 : i32
    return %arg0, %arg2 : i32, i32
  }
  func.func @transform_1(%arg0: i32, %arg1: i32, %arg2: i32) -> (i32, i32) {
    %c0_i32 = arith.constant 0 : i32
    return %arg2, %arg1 : i32, i32
  }
  func.func @transform_2(%arg0: i32, %arg1: i32, %arg2: i32) -> (i32, i32) {
    %c0_i32 = arith.constant 0 : i32
    %c0_i32_0 = arith.constant 0 : i32
    return %c0_i32, %arg1 : i32, i32
  }
  func.func @transform_3(%arg0: i32, %arg1: i32, %arg2: i32) -> (i32, i32) {
    %c0_i32 = arith.constant 0 : i32
    return %arg0, %arg1 : i32, i32
  }
}

</mosaic_0001>

<bundles_post_ra>
// kernel: tpu_custom_call.1
= control target key start
LH: loop header
LB: loop body
LE: loop exit
PB: predicated region body
PF: predicated region fallthrough
CT: control target
= control target key end

     0   :  { %8 = vsyncpa [#allocation3], 0  ;;  %s667_s0 = inlined_call_operand.hbm [shape: bf16[128,128], index: 0, kind: input, shape index: {}]   ;;  %s668_s1 = inlined_call_operand.hbm [shape: bf16[128,128], index: 1, kind: input, shape index: {}]   ;;  %s669_s2 = inlined_call_operand.vmem [shape: f32[1,128], index: 2, kind: input, shape index: {}]   ;;  %s670_s3 = inlined_call_operand.hbm [shape: bf16[128,128], index: 3, kind: output, shape index: {}]  }
   0x1   :  { %9 = vsyncpa [#allocation6], 0 }
   0x2   :  { %10 = vsyncpa [#allocation4], 0  ;;  %s621_s12 = smov [#allocation2]  }
   0x3   :  { %s16_s13 = sshll.u32 %s621_s12, 4  ;;  %s17_s13 = int_to_ptr.vmem [resolvable:$true] %s16_s13 }
   0x4   :  { %s563_s14 = scalar_lea.vmem %s17_s13, 1024  ;;  %p568_p1 = scmp.lt.s32.totalorder %s17_s13, %s17_s13 }
   0x5   :  { %p564_p0 = scmp.ne.s32.totalorder %s17_s13, %s563_s14  ;;  %p569_p2 = scmp.lt.s32.totalorder %s563_s14, %s563_s14 }
   0x7   :  { %p570_p3 = por %p569_p2, %p568_p1 }
   0x9   :  { %p571_p4 = pnand %p570_p3, %p564_p0 }
   0xb   :  { %574 = shalt.err (!%p571_p4)
}
   0xc   :  { %s622_s15 = smov 64   ;;  %s623_s16 = smov 4  }
   0xd   :  { %22 = dma.hbm_to_vmem [thread:$0]  %s667_s0, 1024, %s17_s13, [#allocation3], %s622_s15, %s622_s15, %s623_s16  }
   0xe   :  { %s624_s19 = smov [#allocation5]  }
   0xf   :  { %s28_s20 = sshll.u32 %s624_s19, 4  ;;  %s29_s20 = int_to_ptr.vmem [resolvable:$true] %s28_s20 }
  0x10   :  { %s583_s21 = scalar_lea.vmem %s29_s20, 1024  ;;  %p588_p6 = scmp.lt.s32.totalorder %s29_s20, %s29_s20 }
  0x11   :  { %p584_p5 = scmp.ne.s32.totalorder %s29_s20, %s583_s21  ;;  %p589_p7 = scmp.lt.s32.totalorder %s583_s21, %s583_s21 }
  0x13   :  { %p590_p8 = por %p589_p7, %p588_p6 }
  0x15   :  { %p591_p9 = pnand %p590_p8, %p584_p5 }
  0x17   :  { %594 = shalt.err (!%p591_p9)
}
  0x18   :  { %34 = dma.hbm_to_vmem [thread:$0]  %s668_s1, 1024, %s29_s20, [#allocation6], %s622_s15, %s622_s15, %s623_s16  }
  0x19   :  { %615 = dma.done.wait [#allocation3], 1024  }
  0x1a   :  { %616 = vsyncadd [#allocation3], 4294966272 }
  0x1b   :  { %617 = dma.done.wait [#allocation6], 1024  }
  0x1c   :  { %618 = vsyncadd [#allocation6], 4294966272  ;;  %v539_v0 = vld [vmem:[#allocation5 + $0x38] sm:$0xff]   ;;  %v540_v1 = vld [vmem:[#allocation5 + $0x30] sm:$0xff]  }
  0x1d   :  { %486 = vmatprep.subr.bf16.mxu0 %v539_v0  ;;  %518 = vmatprep.subr.bf16.mxu1 %v539_v0  ;;  %v541_v2 = vld [vmem:[#allocation5 + $0x28] sm:$0xff]   ;;  %v542_v3 = vld [vmem:[#allocation5 + $0x20] sm:$0xff]   ;;  %v543_v6 = vld [vmem:[#allocation5 + $0x18] sm:$0xff]  }
  0x1e   :  { %487 = vmatpush3.bf16.msra.mxu0 %v539_v0  ;;  %526 = vmatpush3.bf16.msra.mxu1 %v539_v0  ;;  %v547_v4 = vld [vmem:[#allocation2] sm:$0xff]   ;;  %v544_v7 = vld [vmem:[#allocation5 + $0x10] sm:$0xff]   ;;  %v545_v8 = vld [vmem:[#allocation5 + $0x8] sm:$0xff]  }
  0x1f   :  { %488 = vmatprep.subr.bf16.mxu0 %v540_v1  ;;  %519 = vmatprep.subr.bf16.mxu1 %v540_v1  ;;  %v548_v5 = vld [vmem:[#allocation2 + $0x20] sm:$0xff]   ;;  %v549_v10 = vld [vmem:[#allocation2 + $0x8] sm:$0xff]   ;;  %v551_v12 = vld [vmem:[#allocation2 + $0x10] sm:$0xff]  }
  0x20   :  { %502 = vmatprep.mubr.bf16.mxu0 %v547_v4  ;;  %510 = vmatprep.mubr.bf16.mxu1 %v548_v5  ;;  %v546_v9 = vld [vmem:[#allocation5] sm:$0xff]   ;;  %v550_v11 = vld [vmem:[#allocation2 + $0x28] sm:$0xff]   ;;  %v552_v13 = vld [vmem:[#allocation2 + $0x30] sm:$0xff]  }
  0x21   :  { %v553_v14 = vld [vmem:[#allocation2 + $0x18] sm:$0xff]   ;;  %v374_v18 = vld [vmem:[%s669_s2] ss:$0 sm:$0xff]  ;;  %s625_s2 = smov [#allocation7]  }
  0x22   :  { %489 = vmatpush3.bf16.msra.mxu0 %v540_v1  ;;  %527 = vmatpush3.bf16.msra.mxu1 %v540_v1  ;;  %v554_v15 = vld [vmem:[#allocation2 + $0x38] sm:$0xff]   ;;  %s361_s24 = sshll.u32 %s625_s2, 4  ;;  %s362_s24 = int_to_ptr.vmem [resolvable:$true] %s361_s24 }
  0x23   :  { %490 = vmatprep.subr.bf16.mxu0 %v541_v2  ;;  %520 = vmatprep.subr.bf16.mxu1 %v541_v2  ;;  %s595_s25 = scalar_lea.vmem %s362_s24, 1024  ;;  %p600_p11 = scmp.lt.s32.totalorder %s362_s24, %s362_s24 }
  0x24   :  { %p596_p10 = scmp.ne.s32.totalorder %s362_s24, %s595_s25  ;;  %p601_p12 = scmp.lt.s32.totalorder %s595_s25, %s595_s25 }
  0x26   :  { %491 = vmatpush3.bf16.msra.mxu0 %v541_v2  ;;  %528 = vmatpush3.bf16.msra.mxu1 %v541_v2  ;;  %p602_p13 = por %p601_p12, %p600_p11 }
  0x27   :  { %492 = vmatprep.subr.bf16.mxu0 %v542_v3  ;;  %521 = vmatprep.subr.bf16.mxu1 %v542_v3 }
  0x28   :  { %p603_p0 = pnand %p602_p13, %p596_p10 }
  0x2a   :  { %493 = vmatpush3.bf16.msra.mxu0 %v542_v3  ;;  %529 = vmatpush3.bf16.msra.mxu1 %v542_v3 }
  0x2b   :  { %494 = vmatprep.subr.bf16.mxu0 %v543_v6  ;;  %522 = vmatprep.subr.bf16.mxu1 %v543_v6 }
  0x2e   :  { %495 = vmatpush3.bf16.msra.mxu0 %v543_v6  ;;  %530 = vmatpush3.bf16.msra.mxu1 %v543_v6 }
  0x2f   :  { %496 = vmatprep.subr.bf16.mxu0 %v544_v7  ;;  %523 = vmatprep.subr.bf16.mxu1 %v544_v7 }
  0x32   :  { %497 = vmatpush3.bf16.msra.mxu0 %v544_v7  ;;  %531 = vmatpush3.bf16.msra.mxu1 %v544_v7 }
  0x33   :  { %498 = vmatprep.subr.bf16.mxu0 %v545_v8  ;;  %524 = vmatprep.subr.bf16.mxu1 %v545_v8 }
  0x36   :  { %499 = vmatpush3.bf16.msra.mxu0 %v545_v8  ;;  %532 = vmatpush3.bf16.msra.mxu1 %v545_v8 }
  0x37   :  { %500 = vmatprep.subr.bf16.mxu0 %v546_v9  ;;  %525 = vmatprep.subr.bf16.mxu1 %v546_v9 }
  0x3a   :  { %501 = vmatpush3.bf16.msra.mxu0 %v546_v9  ;;  %533 = vmatpush3.bf16.msra.mxu1 %v546_v9 }
  0x3d   :  { %503 = vmatmul.mubr.bf16.vlgmr.msra.gmra.mxu0 %v549_v10  ;;  %511 = vmatmul.mubr.bf16.vlgmr.msra.gmra.mxu1 %v550_v11 }
  0x3e   :  { %506 = vmatprep.mubr.bf16.mxu0 %v551_v12  ;;  %514 = vmatprep.mubr.bf16.mxu1 %v552_v13 }
  0x45   :  { %507 = vmatmul.mubr.bf16.gmra.mxu0 %v553_v14  ;;  %515 = vmatmul.mubr.bf16.gmra.mxu1 %v554_v15 }
  0xfd   :  { %v504_v16 = vpop.f32.mrf.mxu0  ;;  %v512_v17 = vpop.f32.mrf.mxu1 }
  0xfe   :  { %v222_v23 = vadd.f32 %v504_v16, %v374_v18  ;;  %v254_v24 = vadd.f32 %v512_v17, %v374_v18 }
  0xff   :  { %v213_v19 = vpop.f32.mrf.mxu0  ;;  %v245_v20 = vpop.f32.mrf.mxu1 }
 0x100   :  { %v214_v27 = vadd.f32 %v374_v18, %v213_v19  ;;  %v246_v28 = vadd.f32 %v374_v18, %v245_v20 }
 0x101   :  { %v505_v21 = vpop.f32.mrf.mxu0  ;;  %v513_v22 = vpop.f32.mrf.mxu1 }
 0x102   :  { %v225_v25 = vadd.f32 %v505_v21, %v374_v18  ;;  %v257_v26 = vadd.f32 %v513_v22, %v374_v18 }
 0x103   :  { %v216_v29 = vpop.f32.mrf.mxu0  ;;  %v248_v30 = vpop.f32.mrf.mxu1 }
 0x104   :  { %v431_v31 = vpack.c.bf16 %v225_v25, %v222_v23  ;;  %v451_v32 = vpack.c.bf16 %v257_v26, %v254_v24  ;;  %v217_v33 = vadd.f32 %v374_v18, %v216_v29  ;;  %v249_v34 = vadd.f32 %v374_v18, %v248_v30 }
 0x105   :  { %v508_v35 = vpop.f32.mrf.mxu0  ;;  %v516_v36 = vpop.f32.mrf.mxu1 }
 0x106   :  { %463 = vst [vmem:[#allocation7 + $0x8] sm:$0xff] %v431_v31   ;;  %467 = vst [vmem:[#allocation7 + $0x28] sm:$0xff] %v451_v32   ;;  %v426_v37 = vpack.c.bf16 %v217_v33, %v214_v27  ;;  %v446_v38 = vpack.c.bf16 %v249_v34, %v246_v28  ;;  %v238_v43 = vadd.f32 %v508_v35, %v374_v18 }
 0x107   :  { %v229_v39 = vpop.f32.mrf.mxu0  ;;  %v261_v40 = vpop.f32.mrf.mxu1  ;;  %v270_v44 = vadd.f32 %v516_v36, %v374_v18 }
 0x108   :  { %427 = vst [vmem:[#allocation7] sm:$0xff] %v426_v37   ;;  %466 = vst [vmem:[#allocation7 + $0x20] sm:$0xff] %v446_v38   ;;  %v230_v47 = vadd.f32 %v374_v18, %v229_v39  ;;  %v262_v48 = vadd.f32 %v374_v18, %v261_v40 }
 0x109   :  { %v509_v41 = vpop.f32.mrf.mxu0  ;;  %v517_v42 = vpop.f32.mrf.mxu1 }
 0x10a   :  { %v241_v45 = vadd.f32 %v509_v41, %v374_v18  ;;  %v273_v46 = vadd.f32 %v517_v42, %v374_v18 }
 0x10b   :  { %v232_v49 = vpop.f32.mrf.mxu0  ;;  %v264_v50 = vpop.f32.mrf.mxu1 }
 0x10c   :  { %v441_v51 = vpack.c.bf16 %v241_v45, %v238_v43  ;;  %v461_v52 = vpack.c.bf16 %v273_v46, %v270_v44  ;;  %v233_v53 = vadd.f32 %v374_v18, %v232_v49  ;;  %v265_v54 = vadd.f32 %v374_v18, %v264_v50 }
 0x10e   :  { %465 = vst [vmem:[#allocation7 + $0x18] sm:$0xff] %v441_v51   ;;  %469 = vst [vmem:[#allocation7 + $0x38] sm:$0xff] %v461_v52   ;;  %v436_v55 = vpack.c.bf16 %v233_v53, %v230_v47  ;;  %v456_v56 = vpack.c.bf16 %v265_v54, %v262_v48 }
 0x110   :  { %464 = vst [vmem:[#allocation7 + $0x10] sm:$0xff] %v436_v55   ;;  %468 = vst [vmem:[#allocation7 + $0x30] sm:$0xff] %v456_v56  }
 0x111   :  { %606 = shalt.err (!%p603_p0)
}
 0x112   :  { %367 = dma.vmem_to_hbm [thread:$0]  %s362_s24, 1024, %s670_s3, [#allocation4], %s622_s15, %s622_s15, %s623_s16  }
 0x113   :  { %619 = dma.done.wait [#allocation4], 1024  }
 0x114   :  { %620 = vsyncadd [#allocation4], 4294966272 }
 0x115   :  { %371 = vsyncpa [#allocation3], 1 }
 0x116   :  { %372 = vsyncpa [#allocation6], 1 }
 0x117   :  { %373 = vsyncpa [#allocation4], 1 }

// kernel: tpu_custom_call.1
= control target key start
LH: loop header
LB: loop body
LE: loop exit
PB: predicated region body
PF: predicated region fallthrough
CT: control target
= control target key end

     0   :  { %8 = vsyncpa [#allocation3], 0  ;;  %s667_s0 = inlined_call_operand.hbm [shape: bf16[128,128], index: 0, kind: input, shape index: {}]   ;;  %s668_s1 = inlined_call_operand.hbm [shape: bf16[128,128], index: 1, kind: input, shape index: {}]   ;;  %s669_s2 = inlined_call_operand.vmem [shape: f32[1,128], index: 2, kind: input, shape index: {}]   ;;  %s670_s3 = inlined_call_operand.hbm [shape: bf16[128,128], index: 3, kind: output, shape index: {}]  }
   0x1   :  { %9 = vsyncpa [#allocation6], 0 }
   0x2   :  { %10 = vsyncpa [#allocation4], 0  ;;  %s621_s12 = smov [#allocation2]  }
   0x3   :  { %s16_s13 = sshll.u32 %s621_s12, 4  ;;  %s17_s13 = int_to_ptr.vmem [resolvable:$true] %s16_s13 }
   0x4   :  { %s563_s14 = scalar_lea.vmem %s17_s13, 1024  ;;  %p568_p1 = scmp.lt.s32.totalorder %s17_s13, %s17_s13 }
   0x5   :  { %p564_p0 = scmp.ne.s32.totalorder %s17_s13, %s563_s14  ;;  %p569_p2 = scmp.lt.s32.totalorder %s563_s14, %s563_s14 }
   0x7   :  { %p570_p3 = por %p569_p2, %p568_p1 }
   0x9   :  { %p571_p4 = pnand %p570_p3, %p564_p0 }
   0xb   :  { %574 = shalt.err (!%p571_p4)
}
   0xc   :  { %s622_s15 = smov 64   ;;  %s623_s16 = smov 4  }
   0xd   :  { %22 = dma.hbm_to_vmem [thread:$0]  %s667_s0, 1024, %s17_s13, [#allocation3], %s622_s15, %s622_s15, %s623_s16  }
   0xe   :  { %s624_s19 = smov [#allocation5]  }
   0xf   :  { %s28_s20 = sshll.u32 %s624_s19, 4  ;;  %s29_s20 = int_to_ptr.vmem [resolvable:$true] %s28_s20 }
  0x10   :  { %s583_s21 = scalar_lea.vmem %s29_s20, 1024  ;;  %p588_p6 = scmp.lt.s32.totalorder %s29_s20, %s29_s20 }
  0x11   :  { %p584_p5 = scmp.ne.s32.totalorder %s29_s20, %s583_s21  ;;  %p589_p7 = scmp.lt.s32.totalorder %s583_s21, %s583_s21 }
  0x13   :  { %p590_p8 = por %p589_p7, %p588_p6 }
  0x15   :  { %p591_p9 = pnand %p590_p8, %p584_p5 }
  0x17   :  { %594 = shalt.err (!%p591_p9)
}
  0x18   :  { %34 = dma.hbm_to_vmem [thread:$0]  %s668_s1, 1024, %s29_s20, [#allocation6], %s622_s15, %s622_s15, %s623_s16  }
  0x19   :  { %615 = dma.done.wait [#allocation3], 1024  }
  0x1a   :  { %616 = vsyncadd [#allocation3], 4294966272 }
  0x1b   :  { %617 = dma.done.wait [#allocation6], 1024  }
  0x1c   :  { %618 = vsyncadd [#allocation6], 4294966272  ;;  %v539_v0 = vld [vmem:[#allocation5 + $0x38] sm:$0xff]   ;;  %v540_v1 = vld [vmem:[#allocation5 + $0x30] sm:$0xff]  }
  0x1d   :  { %486 = vmatprep.subr.bf16.mxu0 %v539_v0  ;;  %518 = vmatprep.subr.bf16.mxu1 %v539_v0  ;;  %v541_v2 = vld [vmem:[#allocation5 + $0x28] sm:$0xff]   ;;  %v542_v3 = vld [vmem:[#allocation5 + $0x20] sm:$0xff]   ;;  %v543_v6 = vld [vmem:[#allocation5 + $0x18] sm:$0xff]  }
  0x1e   :  { %487 = vmatpush3.bf16.msra.mxu0 %v539_v0  ;;  %526 = vmatpush3.bf16.msra.mxu1 %v539_v0  ;;  %v547_v4 = vld [vmem:[#allocation2] sm:$0xff]   ;;  %v544_v7 = vld [vmem:[#allocation5 + $0x10] sm:$0xff]   ;;  %v545_v8 = vld [vmem:[#allocation5 + $0x8] sm:$0xff]  }
  0x1f   :  { %488 = vmatprep.subr.bf16.mxu0 %v540_v1  ;;  %519 = vmatprep.subr.bf16.mxu1 %v540_v1  ;;  %v548_v5 = vld [vmem:[#allocation2 + $0x20] sm:$0xff]   ;;  %v549_v10 = vld [vmem:[#allocation2 + $0x8] sm:$0xff]   ;;  %v551_v12 = vld [vmem:[#allocation2 + $0x10] sm:$0xff]  }
  0x20   :  { %502 = vmatprep.mubr.bf16.mxu0 %v547_v4  ;;  %510 = vmatprep.mubr.bf16.mxu1 %v548_v5  ;;  %v546_v9 = vld [vmem:[#allocation5] sm:$0xff]   ;;  %v550_v11 = vld [vmem:[#allocation2 + $0x28] sm:$0xff]   ;;  %v552_v13 = vld [vmem:[#allocation2 + $0x30] sm:$0xff]  }
  0x21   :  { %v553_v14 = vld [vmem:[#allocation2 + $0x18] sm:$0xff]   ;;  %v374_v18 = vld [vmem:[%s669_s2] ss:$0 sm:$0xff]  ;;  %s625_s2 = smov [#allocation7]  }
  0x22   :  { %489 = vmatpush3.bf16.msra.mxu0 %v540_v1  ;;  %527 = vmatpush3.bf16.msra.mxu1 %v540_v1  ;;  %v554_v15 = vld [vmem:[#allocation2 + $0x38] sm:$0xff]   ;;  %s361_s24 = sshll.u32 %s625_s2, 4  ;;  %s362_s24 = int_to_ptr.vmem [resolvable:$true] %s361_s24 }
  0x23   :  { %490 = vmatprep.subr.bf16.mxu0 %v541_v2  ;;  %520 = vmatprep.subr.bf16.mxu1 %v541_v2  ;;  %s595_s25 = scalar_lea.vmem %s362_s24, 1024  ;;  %p600_p11 = scmp.lt.s32.totalorder %s362_s24, %s362_s24 }
  0x24   :  { %p596_p10 = scmp.ne.s32.totalorder %s362_s24, %s595_s25  ;;  %p601_p12 = scmp.lt.s32.totalorder %s595_s25, %s595_s25 }
  0x26   :  { %491 = vmatpush3.bf16.msra.mxu0 %v541_v2  ;;  %528 = vmatpush3.bf16.msra.mxu1 %v541_v2  ;;  %p602_p13 = por %p601_p12, %p600_p11 }
  0x27   :  { %492 = vmatprep.subr.bf16.mxu0 %v542_v3  ;;  %521 = vmatprep.subr.bf16.mxu1 %v542_v3 }
  0x28   :  { %p603_p0 = pnand %p602_p13, %p596_p10 }
  0x2a   :  { %493 = vmatpush3.bf16.msra.mxu0 %v542_v3  ;;  %529 = vmatpush3.bf16.msra.mxu1 %v542_v3 }
  0x2b   :  { %494 = vmatprep.subr.bf16.mxu0 %v543_v6  ;;  %522 = vmatprep.subr.bf16.mxu1 %v543_v6 }
  0x2e   :  { %495 = vmatpush3.bf16.msra.mxu0 %v543_v6  ;;  %530 = vmatpush3.bf16.msra.mxu1 %v543_v6 }
  0x2f   :  { %496 = vmatprep.subr.bf16.mxu0 %v544_v7  ;;  %523 = vmatprep.subr.bf16.mxu1 %v544_v7 }
  0x32   :  { %497 = vmatpush3.bf16.msra.mxu0 %v544_v7  ;;  %531 = vmatpush3.bf16.msra.mxu1 %v544_v7 }
  0x33   :  { %498 = vmatprep.subr.bf16.mxu0 %v545_v8  ;;  %524 = vmatprep.subr.bf16.mxu1 %v545_v8 }
  0x36   :  { %499 = vmatpush3.bf16.msra.mxu0 %v545_v8  ;;  %532 = vmatpush3.bf16.msra.mxu1 %v545_v8 }
  0x37   :  { %500 = vmatprep.subr.bf16.mxu0 %v546_v9  ;;  %525 = vmatprep.subr.bf16.mxu1 %v546_v9 }
  0x3a   :  { %501 = vmatpush3.bf16.msra.mxu0 %v546_v9  ;;  %533 = vmatpush3.bf16.msra.mxu1 %v546_v9 }
  0x3d   :  { %503 = vmatmul.mubr.bf16.vlgmr.msra.gmra.mxu0 %v549_v10  ;;  %511 = vmatmul.mubr.bf16.vlgmr.msra.gmra.mxu1 %v550_v11 }
  0x3e   :  { %506 = vmatprep.mubr.bf16.mxu0 %v551_v12  ;;  %514 = vmatprep.mubr.bf16.mxu1 %v552_v13 }
  0x45   :  { %507 = vmatmul.mubr.bf16.gmra.mxu0 %v553_v14  ;;  %515 = vmatmul.mubr.bf16.gmra.mxu1 %v554_v15 }
  0xfd   :  { %v504_v16 = vpop.f32.mrf.mxu0  ;;  %v512_v17 = vpop.f32.mrf.mxu1 }
  0xfe   :  { %v222_v23 = vadd.f32 %v504_v16, %v374_v18  ;;  %v254_v24 = vadd.f32 %v512_v17, %v374_v18 }
  0xff   :  { %v213_v19 = vpop.f32.mrf.mxu0  ;;  %v245_v20 = vpop.f32.mrf.mxu1 }
 0x100   :  { %v214_v27 = vadd.f32 %v374_v18, %v213_v19  ;;  %v246_v28 = vadd.f32 %v374_v18, %v245_v20 }
 0x101   :  { %v505_v21 = vpop.f32.mrf.mxu0  ;;  %v513_v22 = vpop.f32.mrf.mxu1 }
 0x102   :  { %v225_v25 = vadd.f32 %v505_v21, %v374_v18  ;;  %v257_v26 = vadd.f32 %v513_v22, %v374_v18 }
 0x103   :  { %v216_v29 = vpop.f32.mrf.mxu0  ;;  %v248_v30 = vpop.f32.mrf.mxu1 }
 0x104   :  { %v431_v31 = vpack.c.bf16 %v225_v25, %v222_v23  ;;  %v451_v32 = vpack.c.bf16 %v257_v26, %v254_v24  ;;  %v217_v33 = vadd.f32 %v374_v18, %v216_v29  ;;  %v249_v34 = vadd.f32 %v374_v18, %v248_v30 }
 0x105   :  { %v508_v35 = vpop.f32.mrf.mxu0  ;;  %v516_v36 = vpop.f32.mrf.mxu1 }
 0x106   :  { %463 = vst [vmem:[#allocation7 + $0x8] sm:$0xff] %v431_v31   ;;  %467 = vst [vmem:[#allocation7 + $0x28] sm:$0xff] %v451_v32   ;;  %v426_v37 = vpack.c.bf16 %v217_v33, %v214_v27  ;;  %v446_v38 = vpack.c.bf16 %v249_v34, %v246_v28  ;;  %v238_v43 = vadd.f32 %v508_v35, %v374_v18 }
 0x107   :  { %v229_v39 = vpop.f32.mrf.mxu0  ;;  %v261_v40 = vpop.f32.mrf.mxu1  ;;  %v270_v44 = vadd.f32 %v516_v36, %v374_v18 }
 0x108   :  { %427 = vst [vmem:[#allocation7] sm:$0xff] %v426_v37   ;;  %466 = vst [vmem:[#allocation7 + $0x20] sm:$0xff] %v446_v38   ;;  %v230_v47 = vadd.f32 %v374_v18, %v229_v39  ;;  %v262_v48 = vadd.f32 %v374_v18, %v261_v40 }
 0x109   :  { %v509_v41 = vpop.f32.mrf.mxu0  ;;  %v517_v42 = vpop.f32.mrf.mxu1 }
 0x10a   :  { %v241_v45 = vadd.f32 %v509_v41, %v374_v18  ;;  %v273_v46 = vadd.f32 %v517_v42, %v374_v18 }
 0x10b   :  { %v232_v49 = vpop.f32.mrf.mxu0  ;;  %v264_v50 = vpop.f32.mrf.mxu1 }
 0x10c   :  { %v441_v51 = vpack.c.bf16 %v241_v45, %v238_v43  ;;  %v461_v52 = vpack.c.bf16 %v273_v46, %v270_v44  ;;  %v233_v53 = vadd.f32 %v374_v18, %v232_v49  ;;  %v265_v54 = vadd.f32 %v374_v18, %v264_v50 }
 0x10e   :  { %465 = vst [vmem:[#allocation7 + $0x18] sm:$0xff] %v441_v51   ;;  %469 = vst [vmem:[#allocation7 + $0x38] sm:$0xff] %v461_v52   ;;  %v436_v55 = vpack.c.bf16 %v233_v53, %v230_v47  ;;  %v456_v56 = vpack.c.bf16 %v265_v54, %v262_v48 }
 0x110   :  { %464 = vst [vmem:[#allocation7 + $0x10] sm:$0xff] %v436_v55   ;;  %468 = vst [vmem:[#allocation7 + $0x30] sm:$0xff] %v456_v56  }
 0x111   :  { %606 = shalt.err (!%p603_p0)
}
 0x112   :  { %367 = dma.vmem_to_hbm [thread:$0]  %s362_s24, 1024, %s670_s3, [#allocation4], %s622_s15, %s622_s15, %s623_s16  }
 0x113   :  { %619 = dma.done.wait [#allocation4], 1024  }
 0x114   :  { %620 = vsyncadd [#allocation4], 4294966272 }
 0x115   :  { %371 = vsyncpa [#allocation3], 1 }
 0x116   :  { %372 = vsyncpa [#allocation6], 1 }
 0x117   :  { %373 = vsyncpa [#allocation4], 1 }

</bundles_post_ra>
